<compile_context>
chip_gen: v5e
topology: v5e:2x2
jax: 0.10.0
libtpu: 0.0.40
codegen_flags: <defaults>
</compile_context>

<pallas_src>
import jax
import jax.numpy as jnp
from jax import lax
from jax.experimental import pallas as pl
from jax.experimental.pallas import tpu as pltpu


def _finetuned_kernel(imp_ref, wi_ref, bi_ref, wc_ref, bc_ref, out_ref):
    # ImpEncoder: Linear (f32 accumulation on the MXU).
    imp_emb = jnp.dot(imp_ref[...], wi_ref[...],
                      preferred_element_type=jnp.float32) + bi_ref[...]

    # F.normalize(p=2, dim=1): x / max(||x||, 1e-12).
    # Implemented as x * rsqrt(max(sumsq, 1e-24)) — mathematically identical
    # (sqrt monotone, sqrt(1e-24) == 1e-12) and runs on the EUP instead of a
    # VALU divide chain.
    sumsq = jnp.sum(imp_emb * imp_emb, axis=1, keepdims=True)
    inv_norm = lax.rsqrt(jnp.maximum(sumsq, 1e-24))
    imp_norm = imp_emb * inv_norm          # single vmul feeding the MXU

    # ClassifierDecoder: Linear (lane-dense, padded output).
    logits = jnp.dot(imp_norm, wc_ref[...],
                     preferred_element_type=jnp.float32) + bc_ref[...]
    out_ref[...] = logits.astype(out_ref.dtype)


def finetuned_model(text_input, imp_input, params, *, tb=None):
    """FineTunedModel forward as one fused Pallas kernel.

    text_input is accepted for API parity with the PyTorch module but is dead
    with respect to the returned logits, so it never enters the kernel.
    """
    del text_input  # dead w.r.t. classification_logits (see module spec)

    wi = params["wi"].astype(jnp.float32)
    bi = params["bi"].astype(jnp.float32)
    wc = params["wc"].astype(jnp.float32)
    bc = params["bc"].astype(jnp.float32)

    imp = imp_input.astype(jnp.float32)
    B, F_imp = imp.shape
    E = wi.shape[1]
    C = wc.shape[1]

    # Lane-dense output: pad num_classes up to a multiple of 128 so stores are
    # full vst instead of masked vst.msk. Extra MXU columns are free here.
    C_pad = max(128, pl.cdiv(C, 128) * 128)
    wc_p = jnp.zeros((E, C_pad), jnp.float32).at[:, :C].set(wc)
    bc_p = jnp.zeros((1, C_pad), jnp.float32).at[:, :C].set(bc.reshape(1, C))

    # Batch tile: multiple of 8 sublanes. Small batches run in one grid step;
    # large batches tile at 128 rows (grid axis marked "parallel" for megacore).
    B8 = pl.cdiv(B, 8) * 8
    if tb is None:
        tb = min(B8, 128)
    tb = pl.cdiv(tb, 8) * 8
    B_pad = pl.cdiv(B8, tb) * tb
    if B_pad != B:
        imp = jnp.zeros((B_pad, F_imp), jnp.float32).at[:B].set(imp)
    grid = (B_pad // tb,)

    out = pl.pallas_call(
        _finetuned_kernel,
        out_shape=jax.ShapeDtypeStruct((B_pad, C_pad), jnp.float32),
        grid=grid,
        in_specs=[
            pl.BlockSpec((tb, F_imp), lambda i: (i, 0)),       # imp rows
            pl.BlockSpec((F_imp, E), lambda i: (0, 0)),        # Wi (resident)
            pl.BlockSpec((1, E), lambda i: (0, 0)),            # bi (resident)
            pl.BlockSpec((E, C_pad), lambda i: (0, 0)),        # Wc (resident)
            pl.BlockSpec((1, C_pad), lambda i: (0, 0)),        # bc (resident)
        ],
        out_specs=pl.BlockSpec((tb, C_pad), lambda i: (i, 0)),
        compiler_params=pltpu.CompilerParams(
            dimension_semantics=("parallel",)),                 # 2x on v7x
    )(imp, wi, bi.reshape(1, E), wc_p, bc_p)

    return out[:B, :C]


def _reference(text_input, imp_input, params):
    # Faithful to the PyTorch forward (F.normalize with eps=1e-12).
    imp_emb = imp_input.astype(jnp.float32) @ params["wi"] + params["bi"]
    norm = jnp.sqrt(jnp.sum(imp_emb * imp_emb, axis=1, keepdims=True))
    imp_norm = imp_emb / jnp.maximum(norm, 1e-12)
    return imp_norm @ params["wc"] + params["bc"]


if __name__ == "__main__":
    # Small shapes consistent with the module.
    batch = 16
    text_feat = 64
    imp_feat = 64
    embedding_dim = 32
    num_classes = 10

    key = jax.random.PRNGKey(0)
    ks = jax.random.split(key, 8)

    text_input = jax.random.normal(ks[0], (batch, text_feat), jnp.float32)
    imp_input = jax.random.normal(ks[1], (batch, imp_feat), jnp.float32)

    # Deterministic Linear-style init.
    def init_linear(k, fan_in, fan_out):
        kw, kb = jax.random.split(k)
        bound = 1.0 / jnp.sqrt(fan_in)
        w = jax.random.uniform(kw, (fan_in, fan_out), jnp.float32, -bound, bound)
        b = jax.random.uniform(kb, (1, fan_out), jnp.float32, -bound, bound)
        return w, b

    wt, bt = init_linear(ks[2], text_feat, embedding_dim)      # TextEncoder (unused)
    wi, bi = init_linear(ks[3], imp_feat, embedding_dim)       # ImpEncoder
    wc, bc = init_linear(ks[4], embedding_dim, num_classes)    # ClassifierDecoder

    params = {"wt": wt, "bt": bt, "wi": wi, "bi": bi, "wc": wc, "bc": bc}

    logits = finetuned_model(text_input, imp_input, params)
    logits = jax.block_until_ready(logits)

    ref = _reference(text_input, imp_input, params)
    assert logits.shape == (batch, num_classes)
    assert jnp.allclose(logits, ref, atol=1e-4, rtol=1e-4)

    print("KERNEL_OK")
</pallas_src>

<mosaic_0001>
module attributes {stable_mosaic.version = 11 : i64} {
  func.func @_finetuned_kernel(%arg0: i32, %arg1: memref<16x64xf32, #tpu.memory_space<vmem>>, %arg2: memref<64x32xf32, #tpu.memory_space<vmem>>, %arg3: memref<1x32xf32, #tpu.memory_space<vmem>>, %arg4: memref<32x128xf32, #tpu.memory_space<vmem>>, %arg5: memref<1x128xf32, #tpu.memory_space<vmem>>, %arg6: memref<16x128xf32, #tpu.memory_space<vmem>>) attributes {dimension_semantics = [#tpu.dimension_semantics<parallel>], iteration_bounds = array<i64: 1>, scalar_prefetch = 0 : i64, scratch_operands = 0 : i64, tpu.core_type = #tpu.core_type<tc>, window_params = [{transform_indices = @transform_0, window_bounds = array<i64: 16, 64>}, {pipeline_mode = #tpu.pipeline_mode<synchronous>, transform_indices = @transform_1, window_bounds = array<i64: 64, 32>}, {pipeline_mode = #tpu.pipeline_mode<synchronous>, transform_indices = @transform_2, window_bounds = array<i64: 1, 32>}, {pipeline_mode = #tpu.pipeline_mode<synchronous>, transform_indices = @transform_3, window_bounds = array<i64: 32, 128>}, {pipeline_mode = #tpu.pipeline_mode<synchronous>, transform_indices = @transform_4, window_bounds = array<i64: 1, 128>}, {transform_indices = @transform_5, window_bounds = array<i64: 16, 128>}]} {
    %c0 = arith.constant 0 : index
    %c0_0 = arith.constant 0 : index
    %0 = vector.load %arg1[%c0, %c0_0] : memref<16x64xf32, #tpu.memory_space<vmem>>, vector<16x64xf32>
    %c0_1 = arith.constant 0 : index
    %c0_2 = arith.constant 0 : index
    %1 = vector.load %arg2[%c0_1, %c0_2] : memref<64x32xf32, #tpu.memory_space<vmem>>, vector<64x32xf32>
    %cst = arith.constant dense<0.000000e+00> : vector<16x32xf32>
    %2 = tpu.matmul %0, %1, %cst {dimension_numbers = #tpu.dot_dimension_numbers<[1], [0], [0], [1], [0, 0, 1, 1], [], []>} : vector<16x64xf32>, vector<64x32xf32>, vector<16x32xf32> -> vector<16x32xf32>
    %c0_3 = arith.constant 0 : index
    %c0_4 = arith.constant 0 : index
    %3 = vector.load %arg3[%c0_3, %c0_4] : memref<1x32xf32, #tpu.memory_space<vmem>>, vector<1x32xf32>
    %4 = vector.broadcast %3 : vector<1x32xf32> to vector<16x32xf32>
    %5 = arith.addf %2, %4 : vector<16x32xf32>
    %6 = arith.mulf %5, %5 : vector<16x32xf32>
    %cst_5 = arith.constant dense<0.000000e+00> : vector<16xf32>
    %7 = vector.multi_reduction <add>, %6, %cst_5 [1] : vector<16x32xf32> to vector<16xf32>
    %8 = vector.shape_cast %7 : vector<16xf32> to vector<16x1xf32>
    %cst_6 = arith.constant 1.000000e-24 : f32
    %9 = vector.broadcast %cst_6 : f32 to vector<16x1xf32>
    %10 = arith.maximumf %8, %9 : vector<16x1xf32>
    %11 = math.rsqrt %10 : vector<16x1xf32>
    %12 = vector.broadcast %11 : vector<16x1xf32> to vector<16x32xf32>
    %13 = arith.mulf %5, %12 : vector<16x32xf32>
    %c0_7 = arith.constant 0 : index
    %c0_8 = arith.constant 0 : index
    %14 = vector.load %arg4[%c0_7, %c0_8] : memref<32x128xf32, #tpu.memory_space<vmem>>, vector<32x128xf32>
    %cst_9 = arith.constant dense<0.000000e+00> : vector<16x128xf32>
    %15 = tpu.matmul %13, %14, %cst_9 {dimension_numbers = #tpu.dot_dimension_numbers<[1], [0], [0], [1], [0, 0, 1, 1], [], []>} : vector<16x32xf32>, vector<32x128xf32>, vector<16x128xf32> -> vector<16x128xf32>
    %c0_10 = arith.constant 0 : index
    %c0_11 = arith.constant 0 : index
    %16 = vector.load %arg5[%c0_10, %c0_11] : memref<1x128xf32, #tpu.memory_space<vmem>>, vector<1x128xf32>
    %17 = vector.broadcast %16 : vector<1x128xf32> to vector<16x128xf32>
    %18 = arith.addf %15, %17 : vector<16x128xf32>
    %c0_12 = arith.constant 0 : index
    %c0_13 = arith.constant 0 : index
    %19 = vector.load %arg6[%c0_12, %c0_13] : memref<16x128xf32, #tpu.memory_space<vmem>>, vector<16x128xf32>
    tpu.vector_store %arg6[%c0_12, %c0_13], %18 {strides = array<i32>} : memref<16x128xf32, #tpu.memory_space<vmem>>, vector<16x128xf32>,
    return
  }
  func.func @transform_0(%arg0: i32) -> (i32, i32) {
    %c0_i32 = arith.constant 0 : i32
    %c0_i32_0 = arith.constant 0 : i32
    return %arg0, %c0_i32 : i32, i32
  }
  func.func @transform_1(%arg0: i32) -> (i32, i32) {
    %c0_i32 = arith.constant 0 : i32
    %c0_i32_0 = arith.constant 0 : i32
    %c0_i32_1 = arith.constant 0 : i32
    return %c0_i32, %c0_i32_0 : i32, i32
  }
  func.func @transform_2(%arg0: i32) -> (i32, i32) {
    %c0_i32 = arith.constant 0 : i32
    %c0_i32_0 = arith.constant 0 : i32
    %c0_i32_1 = arith.constant 0 : i32
    return %c0_i32, %c0_i32_0 : i32, i32
  }
  func.func @transform_3(%arg0: i32) -> (i32, i32) {
    %c0_i32 = arith.constant 0 : i32
    %c0_i32_0 = arith.constant 0 : i32
    %c0_i32_1 = arith.constant 0 : i32
    return %c0_i32, %c0_i32_0 : i32, i32
  }
  func.func @transform_4(%arg0: i32) -> (i32, i32) {
    %c0_i32 = arith.constant 0 : i32
    %c0_i32_0 = arith.constant 0 : i32
    %c0_i32_1 = arith.constant 0 : i32
    return %c0_i32, %c0_i32_0 : i32, i32
  }
  func.func @transform_5(%arg0: i32) -> (i32, i32) {
    %c0_i32 = arith.constant 0 : i32
    %c0_i32_0 = arith.constant 0 : i32
    return %arg0, %c0_i32 : i32, i32
  }
}

</mosaic_0001>

<bundles_post_ra>
// kernel: tpu_custom_call.1
= control target key start
LH: loop header
LB: loop body
LE: loop exit
PB: predicated region body
PF: predicated region fallthrough
CT: control target
= control target key end

     0   :  { %s290_s0 = inlined_call_operand.vmem [shape: f32[16,64], index: 0, kind: input, shape index: {}]   ;;  %s291_s1 = inlined_call_operand.vmem [shape: f32[64,32], index: 1, kind: input, shape index: {}]   ;;  %s292_s2 = inlined_call_operand.vmem [shape: f32[1,32], index: 2, kind: input, shape index: {}]   ;;  %s293_s3 = inlined_call_operand.vmem [shape: f32[32,128], index: 3, kind: input, shape index: {}]   ;;  %s294_s4 = inlined_call_operand.vmem [shape: f32[1,128], index: 4, kind: input, shape index: {}]   ;;  %s295_s5 = inlined_call_operand.hbm [shape: f32[16,128], index: 5, kind: output, shape index: {}]  }
   0x1   :  { %v30_v0 = vld [vmem:[%s291_s1 + $0x38] sm:$0xff]  ;;  %v29_v1 = vld [vmem:[%s291_s1 + $0x30] sm:$0xff]  ;;  %v28_v2 = vld [vmem:[%s291_s1 + $0x28] sm:$0xff] }
   0x2   :  { %50 = vmatpush.msra.mxu0 %v30_v0  ;;  %159 = vmatpush.msra.mxu2 %v30_v0  ;;  %v27_v3 = vld [vmem:[%s291_s1 + $0x20] sm:$0xff] }
   0x4   :  { %51 = vmatpush.msra.mxu0 %v29_v1  ;;  %160 = vmatpush.msra.mxu2 %v29_v1 }
   0x5   :  { %10 = vsyncpa [#allocation3], 0  ;;  %v26_v4 = vld [vmem:[%s291_s1 + $0x18] sm:$0xff]  ;;  %v25_v5 = vld [vmem:[%s291_s1 + $0x10] sm:$0xff]  ;;  %vm35_vm0 = vcmask 523264   ;;  %vm67_vm1 = vcmask 261120  }
   0x6   :  { %52 = vmatpush.msra.mxu0 %v28_v2  ;;  %161 = vmatpush.msra.mxu2 %v28_v2  ;;  %v24_v6 = vld [vmem:[%s291_s1 + $0x8] sm:$0xff]  ;;  %v23_v7 = vld [vmem:[%s291_s1] sm:$0xff]  ;;  %v101_v19 = vld [vmem:[%s293_s3 + $0x18] sm:$0xff]  ;;  %s202_s21 = smov [#allocation2]   ;;  %s143_s25 = sshll.u32 %s295_s5, 4  ;;  %s144_s25 = int_to_ptr.hbm [resolvable:$true] %s143_s25 }
   0x7   :  { %v21_v8 = vld [vmem:[%s290_s0] sm:$0xff]  ;;  %v22_v9 = vld [vmem:[%s290_s0 + $0x8] sm:$0xff]  ;;  %124 = vmatpush.msra.mxu1 %v101_v19  ;;  %v100_v20 = vld [vmem:[%s293_s3 + $0x10] sm:$0xff]  ;;  %s141_s22 = sshll.u32 %s202_s21, 4  ;;  %s203_s26 = smov 128   ;;  %s142_s22 = int_to_ptr.vmem [resolvable:$true] %s141_s22 }
   0x8   :  { %53 = vmatpush.msra.mxu0 %v27_v3  ;;  %162 = vmatpush.msra.mxu2 %v27_v3  ;;  %v170_v10 = vld [vmem:[%s292_s2] ss:$0 sm:$0xff]  ;;  %v99_v21 = vld [vmem:[%s293_s3 + $0x8] sm:$0xff]  ;;  %s204_s27 = smov 8  }
   0x9   :  { %125 = vmatpush.msra.mxu1 %v100_v20  ;;  %v98_v22 = vld [vmem:[%s293_s3] sm:$0xff] }
   0xa   :  { %54 = vmatpush.msra.mxu0 %v26_v4  ;;  %163 = vmatpush.msra.mxu2 %v26_v4  ;;  %v171_v43 = vld [vmem:[%s294_s4] ss:$0 sm:$0xff] }
   0xb   :  { %126 = vmatpush.msra.mxu1 %v99_v21 }
   0xc   :  { %55 = vmatpush.msra.mxu0 %v25_v5  ;;  %164 = vmatpush.msra.mxu2 %v25_v5 }
   0xd   :  { %127 = vmatpush.msra.mxu1 %v98_v22 }
   0xe   :  { %56 = vmatpush.msra.mxu0 %v24_v6  ;;  %165 = vmatpush.msra.mxu2 %v24_v6 }
  0x10   :  { %57 = vmatpush.msra.mxu0 %v23_v7  ;;  %166 = vmatpush.msra.mxu2 %v23_v7 }
  0x11   :  { %155 = vmatmul.msk.f32.vlgmr.msra.gmra.mxu0 %vm35_vm0, %v21_v8  ;;  %156 = vmatmul.msk.f32.vlgmr.msra.gmra.mxu2 %vm35_vm0, %v22_v9 }
  0x8e   :  { %v59_v11 = vpop.f32.mrf.mxu0 }
  0x8f   :  { %v60_v12 = vadd.f32 %v170_v10, %v59_v11 }
  0x91   :  { %v65_v13 = vmul.f32 %v60_v12, %v60_v12 }
  0x93   :  { %v68_v14 = vsel %vm67_vm1, %v65_v13, 0.0 }
  0x94   :  { %69 = vadd.xlane.f32.xlu0 %v68_v14  ;;  %v62_v15 = vpop.f32.mrf.mxu2 }
  0x95   :  { %v63_v16 = vadd.f32 %v170_v10, %v62_v15 }
  0x97   :  { %v66_v17 = vmul.f32 %v63_v16, %v63_v16 }
  0x99   :  { %v71_v18 = vsel %vm67_vm1, %v66_v17, 0.0 }
  0x9c   :  { %72 = vadd.xlane.f32.xlu0 %v71_v18 }
 0x107   :  { %v70_v23 = vpop.xlane.xlu0 %69 }
 0x108   :  { %v74_v24 = vmax.f32 %v70_v23, 1e-24 }
 0x10a   :  { %172 = vrsqrt.f32 %v74_v24  ;;  %vm82_vm3 = vweird.f32 %v74_v24 }
 0x10f   :  { %v73_v25 = vpop.xlane.xlu0 %72 }
 0x110   :  { %v173_v26 = vpop.eup %172  ;;  %v75_v27 = vmax.f32 %v73_v25, 1e-24 }
 0x111   :  { %v77_v28 = vmul.f32 %v173_v26, %v74_v24  ;;  %vm83_vm2 = vweird.f32 %v173_v26 }
 0x112   :  { %174 = vrsqrt.f32 %v75_v27  ;;  %vm84_vm4 = vmor %vm82_vm3, %vm83_vm2  ;;  %vm92_vm6 = vweird.f32 %v75_v27 }
 0x113   :  { %v78_v29 = vmul.f32 %v173_v26, %v77_v28 }
 0x115   :  { %v79_v30 = vmul.f32 0.5, %v78_v29 }
 0x117   :  { %v80_v31 = vsub.f32 1.5, %v79_v30 }
 0x118   :  { %v175_v32 = vpop.eup %174 }
 0x119   :  { %v87_v33 = vmul.f32 %v175_v32, %v75_v27  ;;  %v81_v34 = vmul.f32 %v173_v26, %v80_v31  ;;  %vm93_vm5 = vweird.f32 %v175_v32 }
 0x11a   :  { %vm94_vm7 = vmor %vm92_vm6, %vm93_vm5 }
 0x11b   :  { %v88_v35 = vmul.f32 %v175_v32, %v87_v33  ;;  %v85_v36 = vsel %vm84_vm4, %v173_v26, %v81_v34 }
 0x11c   :  { %v96_v37 = vmul.f32 %v85_v36, %v60_v12 }
 0x11d   :  { %v89_v38 = vmul.f32 0.5, %v88_v35 }
 0x11e   :  { %157 = vmatmul.msk.f32.vlgmr.msra.gmra.mxu1 %vm67_vm1, %v96_v37 }
 0x11f   :  { %v90_v39 = vsub.f32 1.5, %v89_v38 }
 0x121   :  { %v91_v40 = vmul.f32 %v175_v32, %v90_v39 }
 0x123   :  { %v95_v41 = vsel %vm94_vm7, %v175_v32, %v91_v40 }
 0x124   :  { %v97_v42 = vmul.f32 %v95_v41, %v63_v16 }
 0x126   :  { %158 = vmatmul.msk.f32.gmra.mxu1 %vm67_vm1, %v97_v42 }
 0x19b   :  { %v129_v44 = vpop.f32.mrf.mxu1 }
 0x19c   :  { %v130_v45 = vadd.f32 %v171_v43, %v129_v44 }
 0x19e   :  { %135 = vst [vmem:[#allocation2] sm:$0xff] %v130_v45 }
 0x1a3   :  { %v132_v46 = vpop.f32.mrf.mxu1 }
 0x1a4   :  { %v133_v47 = vadd.f32 %v171_v43, %v132_v46 }
 0x1a6   :  { %136 = vst [vmem:[#allocation2 + $0x8] sm:$0xff] %v133_v47 }
 0x1a7   :  { %149 = dma.vmem_to_hbm [thread:$0]  %s142_s22, 256, %s144_s25, [#allocation3], %s203_s26, %s203_s26, %s204_s27  }
 0x1a8   :  { %200 = dma.done.wait [#allocation3], 256  }
 0x1a9   :  { %201 = vsyncadd [#allocation3], 4294967040 }
 0x1aa   :  { %154 = vsyncpa [#allocation3], 1 }

</bundles_post_ra>
